<compile_context>
chip_gen: v5e
topology: v5e:2x2
jax: 0.10.0
libtpu: 0.0.40
codegen_flags: <defaults>
</compile_context>

<pallas_src>
import jax
import jax.numpy as jnp
from jax.experimental import pallas as pl
from jax.experimental.pallas import tpu as pltpu


def cnn_kernel(xt_ref, wct_ref, cb_ref, fw_ref, fb_ref, o_ref):
    # xt_ref : (L, Bt)   bf16  activation tile, batch on lanes (padding folded into wct)
    # wct_ref: (FL, L)   bf16  conv-as-matmul weights, row index = f*L + l_out
    # cb_ref : (FL, 1)   f32   conv bias in flatten order (broadcast over lanes)
    # fw_ref : (1, FL)   f32   fc weight (PyTorch flatten order f*L + l)
    # fb_ref : (1, 1)    f32   fc bias (SMEM scalar)
    # o_ref  : (1, Bt)   f32   lane-dense output tile (batch on lanes)

    # Conv1d(1->F, k=3, pad=1), channel-major flatten == one canonical MXU matmul.
    y = jnp.dot(wct_ref[...], xt_ref[...], preferred_element_type=jnp.float32)   # (FL, Bt)
    y = jnp.maximum(y + cb_ref[...], 0.0)                                        # bias + ReLU, f32

    # Linear(F*L -> 1): contract FL on the natural MXU K axis; output already (1, Bt).
    out = jnp.dot(fw_ref[...], y, preferred_element_type=jnp.float32)            # (1, Bt)
    o_ref[...] = out + fb_ref[0, 0]


def pack_params(conv_w, conv_b, fc_w, fc_b, input_size):
    """Pre-pack PyTorch-layout params into the kernel's matmul form (do once, reuse)."""
    L = int(input_size)
    F = conv_w.shape[0]
    cw = conv_w.reshape(F, 3).astype(jnp.float32)

    # wct[f*L + l_out, l_in] = cw[f, l_in - l_out + 1] when 0 <= l_in - l_out + 1 <= 2, else 0.
    # The k=3 / padding=1 boundary behaviour is encoded here, so no jnp.pad is ever needed.
    l_out = jnp.arange(L)[:, None]
    l_in = jnp.arange(L)[None, :]
    k = l_in - l_out + 1                                    # (L_out, L_in)
    valid = (k >= 0) & (k <= 2)
    tap = jnp.take(cw, jnp.clip(k, 0, 2), axis=1)           # (F, L_out, L_in)
    tap = jnp.where(valid[None, :, :], tap, 0.0)
    wct = tap.reshape(F * L, L).astype(jnp.bfloat16)        # (FL, L), bf16 MXU operand

    cb = jnp.repeat(conv_b.astype(jnp.float32), L).reshape(F * L, 1)    # conv_b[f] at f*L + l
    fw = fc_w.reshape(1, F * L).astype(jnp.float32)                      # PyTorch flatten order
    fb = fc_b.reshape(1, 1).astype(jnp.float32)
    return wct, cb, fw, fb


def _pick_batch_tile(B, b_tile):
    """Tile policy: full block for tiny B; otherwise a multiple of 128 with >=2 grid steps."""
    if B <= 128:
        return B                                   # single full block (block == array dims)
    half = -(-B // 2)                              # ceil(B/2): guarantees >=2 steps (v7x megacore)
    bt = ((half + 127) // 128) * 128               # keep lane-dense, unmasked output stores
    return min(b_tile, bt)


def cnn_forward_packed(x, wct, cb, fw, fb, *, b_tile=4096):
    """x: (B, L) float32; packed params from pack_params(). Returns (B, 1) float32."""
    B, L = x.shape
    FL = wct.shape[0]

    # One fused XLA op: cast to bf16 + transpose -> batch-on-lanes layout for the kernel.
    xt = x.astype(jnp.bfloat16).T                  # (L, B)

    bt = _pick_batch_tile(B, b_tile)
    grid = (pl.cdiv(B, bt),)

    out = pl.pallas_call(
        cnn_kernel,
        out_shape=jax.ShapeDtypeStruct((1, B), jnp.float32),
        grid=grid,
        in_specs=[
            pl.BlockSpec((L, bt), lambda i: (0, i)),            # activation tile (bf16)
            pl.BlockSpec((FL, L), lambda i: (0, 0)),            # conv matrix (resident, bf16)
            pl.BlockSpec((FL, 1), lambda i: (0, 0)),            # conv bias   (resident, f32)
            pl.BlockSpec((1, FL), lambda i: (0, 0)),            # fc weight   (resident, f32)
            pl.BlockSpec(memory_space=pltpu.MemorySpace.SMEM),  # fc bias     (SMEM scalar)
        ],
        out_specs=pl.BlockSpec((1, bt), lambda i: (0, i)),
        compiler_params=pltpu.CompilerParams(dimension_semantics=("parallel",)),
    )(xt, wct, cb, fw, fb)
    return out.reshape(B, 1)


def cnn_forward(x, conv_w, conv_b, fc_w, fc_b):
    """Convenience wrapper taking PyTorch-layout parameters directly."""
    packed = pack_params(conv_w, conv_b, fc_w, fc_b, x.shape[1])
    return cnn_forward_packed(x, *packed)


def ref_forward(x, conv_w, conv_b, fc_w, fc_b):
    """Pure-JAX reference mirroring the PyTorch forward (elementwise + sums, f32)."""
    B, L = x.shape
    xp = jnp.pad(x, ((0, 0), (1, 1)))
    y = (conv_w[:, 0, 0][None, :, None] * xp[:, None, 0:L]
         + conv_w[:, 0, 1][None, :, None] * xp[:, None, 1:L + 1]
         + conv_w[:, 0, 2][None, :, None] * xp[:, None, 2:L + 2]
         + conv_b[None, :, None])
    y = jnp.maximum(y, 0.0)
    flat = y.reshape(B, -1)                                    # channel-major: f*L + l
    return jnp.sum(flat * fc_w, axis=-1, keepdims=True) + fc_b[None, :]


if __name__ == "__main__":
    B = 2            # batch
    L = 16           # input_size (X_train.shape[1])
    F = 16           # initial_filters, num_conv_layers=1 -> out_channels=16

    key = jax.random.PRNGKey(0)
    kx, kcw, kcb, kfw, kfb = jax.random.split(key, 5)

    x = jax.random.normal(kx, (B, L), dtype=jnp.float32)

    # Deterministic parameter init (uniform +-1/sqrt(fan_in), like PyTorch defaults).
    conv_bound = 1.0 / jnp.sqrt(1.0 * 3.0)          # Conv1d fan_in = in_channels * kernel_size
    fc_bound = 1.0 / jnp.sqrt(float(F * L))         # Linear fan_in = F*L
    conv_w = jax.random.uniform(kcw, (F, 1, 3), jnp.float32, -conv_bound, conv_bound)
    conv_b = jax.random.uniform(kcb, (F,), jnp.float32, -conv_bound, conv_bound)
    fc_w = jax.random.uniform(kfw, (1, F * L), jnp.float32, -fc_bound, fc_bound)
    fc_b = jax.random.uniform(kfb, (1,), jnp.float32, -fc_bound, fc_bound)

    # Pack once (amortized across calls), jit the packed forward.
    packed = pack_params(conv_w, conv_b, fc_w, fc_b, L)
    packed = tuple(jax.block_until_ready(p) for p in packed)
    fwd = jax.jit(cnn_forward_packed)

    out = jax.block_until_ready(fwd(x, *packed))
    assert out.shape == (B, 1), out.shape

    # The kernel intentionally quantizes x / conv weights to bf16 for the MXU (accepted
    # precision trade-off per review); quantize the reference inputs the same way so the
    # tolerance stays tight and any structural/indexing bug (orders of magnitude larger)
    # is still caught.
    x_q = x.astype(jnp.bfloat16).astype(jnp.float32)
    cw_q = conv_w.astype(jnp.bfloat16).astype(jnp.float32)
    ref = ref_forward(x_q, cw_q, conv_b, fc_w, fc_b)
    assert jnp.allclose(out, ref, atol=2e-3, rtol=2e-3), (out, ref)

    print("KERNEL_OK")
</pallas_src>

<mosaic_0001>
module attributes {stable_mosaic.version = 11 : i64} {
  func.func @cnn_kernel(%arg0: i32, %arg1: memref<16x2xbf16, #tpu.memory_space<vmem>>, %arg2: memref<256x16xbf16, #tpu.memory_space<vmem>>, %arg3: memref<256x1xf32, #tpu.memory_space<vmem>>, %arg4: memref<1x256xf32, #tpu.memory_space<vmem>>, %arg5: memref<1x1xf32, #tpu.memory_space<smem>>, %arg6: memref<1x2xf32, #tpu.memory_space<vmem>>) attributes {dimension_semantics = [#tpu.dimension_semantics<parallel>], iteration_bounds = array<i64: 1>, scalar_prefetch = 0 : i64, scratch_operands = 0 : i64, tpu.core_type = #tpu.core_type<tc>, window_params = [{transform_indices = @transform_0, window_bounds = array<i64: 16, 2>}, {pipeline_mode = #tpu.pipeline_mode<synchronous>, transform_indices = @transform_1, window_bounds = array<i64: 256, 16>}, {pipeline_mode = #tpu.pipeline_mode<synchronous>, transform_indices = @transform_2, window_bounds = array<i64: 256, 1>}, {pipeline_mode = #tpu.pipeline_mode<synchronous>, transform_indices = @transform_3, window_bounds = array<i64: 1, 256>}, {transform_indices = @transform_4, window_bounds = array<i64: 1, 1>}, {transform_indices = @transform_5, window_bounds = array<i64: 1, 2>}]} {
    %c0 = arith.constant 0 : index
    %c0_0 = arith.constant 0 : index
    %0 = vector.load %arg2[%c0, %c0_0] : memref<256x16xbf16, #tpu.memory_space<vmem>>, vector<256x16xbf16>
    %c0_1 = arith.constant 0 : index
    %c0_2 = arith.constant 0 : index
    %1 = vector.load %arg1[%c0_1, %c0_2] : memref<16x2xbf16, #tpu.memory_space<vmem>>, vector<16x2xbf16>
    %cst = arith.constant dense<0.000000e+00> : vector<256x2xf32>
    %2 = tpu.matmul %0, %1, %cst {dimension_numbers = #tpu.dot_dimension_numbers<[1], [0], [0], [1], [0, 0, 1, 1], [], []>} : vector<256x16xbf16>, vector<16x2xbf16>, vector<256x2xf32> -> vector<256x2xf32>
    %c0_3 = arith.constant 0 : index
    %c0_4 = arith.constant 0 : index
    %3 = vector.load %arg3[%c0_3, %c0_4] : memref<256x1xf32, #tpu.memory_space<vmem>>, vector<256x1xf32>
    %4 = vector.broadcast %3 : vector<256x1xf32> to vector<256x2xf32>
    %5 = arith.addf %2, %4 : vector<256x2xf32>
    %cst_5 = arith.constant 0.000000e+00 : f32
    %6 = vector.broadcast %cst_5 : f32 to vector<256x2xf32>
    %7 = arith.maximumf %5, %6 : vector<256x2xf32>
    %c0_6 = arith.constant 0 : index
    %c0_7 = arith.constant 0 : index
    %8 = vector.load %arg4[%c0_6, %c0_7] : memref<1x256xf32, #tpu.memory_space<vmem>>, vector<1x256xf32>
    %cst_8 = arith.constant dense<0.000000e+00> : vector<1x2xf32>
    %9 = tpu.matmul %8, %7, %cst_8 {dimension_numbers = #tpu.dot_dimension_numbers<[1], [0], [0], [1], [0, 0, 1, 1], [], []>} : vector<1x256xf32>, vector<256x2xf32>, vector<1x2xf32> -> vector<1x2xf32>
    %c0_9 = arith.constant 0 : index
    %c0_10 = arith.constant 0 : index
    %10 = memref.load %arg5[%c0_9, %c0_10] : memref<1x1xf32, #tpu.memory_space<smem>>
    %11 = vector.broadcast %10 : f32 to vector<1x2xf32>
    %12 = arith.addf %9, %11 : vector<1x2xf32>
    %c0_11 = arith.constant 0 : index
    %c0_12 = arith.constant 0 : index
    %13 = vector.load %arg6[%c0_11, %c0_12] : memref<1x2xf32, #tpu.memory_space<vmem>>, vector<1x2xf32>
    tpu.vector_store %arg6[%c0_11, %c0_12], %12 {strides = array<i32>} : memref<1x2xf32, #tpu.memory_space<vmem>>, vector<1x2xf32>,
    return
  }
  func.func @transform_0(%arg0: i32) -> (i32, i32) {
    %c0_i32 = arith.constant 0 : i32
    %c0_i32_0 = arith.constant 0 : i32
    return %c0_i32, %arg0 : i32, i32
  }
  func.func @transform_1(%arg0: i32) -> (i32, i32) {
    %c0_i32 = arith.constant 0 : i32
    %c0_i32_0 = arith.constant 0 : i32
    %c0_i32_1 = arith.constant 0 : i32
    return %c0_i32, %c0_i32_0 : i32, i32
  }
  func.func @transform_2(%arg0: i32) -> (i32, i32) {
    %c0_i32 = arith.constant 0 : i32
    %c0_i32_0 = arith.constant 0 : i32
    %c0_i32_1 = arith.constant 0 : i32
    return %c0_i32, %c0_i32_0 : i32, i32
  }
  func.func @transform_3(%arg0: i32) -> (i32, i32) {
    %c0_i32 = arith.constant 0 : i32
    %c0_i32_0 = arith.constant 0 : i32
    %c0_i32_1 = arith.constant 0 : i32
    return %c0_i32, %c0_i32_0 : i32, i32
  }
  func.func @transform_4(%arg0: i32) -> (i32, i32) {
    %c0_i32 = arith.constant 0 : i32
    %c0_i32_0 = arith.constant 0 : i32
    %c0_i32_1 = arith.constant 0 : i32
    return %c0_i32, %c0_i32_0 : i32, i32
  }
  func.func @transform_5(%arg0: i32) -> (i32, i32) {
    %c0_i32 = arith.constant 0 : i32
    %c0_i32_0 = arith.constant 0 : i32
    return %c0_i32, %arg0 : i32, i32
  }
}

</mosaic_0001>

<bundles_post_ra>
// kernel: cnn_forward_packed.1
= control target key start
LH: loop header
LB: loop body
LE: loop exit
PB: predicated region body
PF: predicated region fallthrough
CT: control target
= control target key end

     0   :  { %v706_v3 = vmov 0   ;;  %vm335_vm0 = vcmask 130048   ;;  %s971_s0 = inlined_call_operand.vmem [shape: bf16[16,2], index: 0, kind: input, shape index: {}]   ;;  %s972_s1 = inlined_call_operand.vmem [shape: bf16[256,16], index: 1, kind: input, shape index: {}]   ;;  %s973_s2 = inlined_call_operand.vmem [shape: f32[256,1], index: 2, kind: input, shape index: {}]   ;;  %s974_s3 = inlined_call_operand.vmem [shape: f32[1,256], index: 3, kind: input, shape index: {}]   ;;  %s975_s4 = inlined_call_operand.<no memory space> [shape: f32[1,1], index: 4, kind: input, shape index: {}]   ;;  %s976_s5 = inlined_call_operand.hbm [shape: f32[1,2], index: 5, kind: output, shape index: {}]  }
   0x1   :  { %v72_v0 = vld [vmem:[%s973_s2 + $0x78] sm:$0xff]  ;;  %v70_v1 = vld [vmem:[%s973_s2 + $0x68] sm:$0xff]  ;;  %679 = vset.pattern.permute.xlu2 %v706_v3  ;;  %678 = vset.pattern.permute.xlu1 %v706_v3  ;;  %v671_v4 = vld [vmem:[%s971_s0] sm:$0xff] }
   0x2   :  { %v68_v2 = vld [vmem:[%s973_s2 + $0x58] sm:$0xff]  ;;  %677 = vset.pattern.permute.xlu0 %v706_v3  ;;  %156 = vperm.xlu1 %678, %v70_v1   ;;  %v655_v5 = vld [vmem:[%s972_s1] sm:$0xff]  ;;  %v661_v7 = vld [vmem:[%s972_s1 + $0x30] sm:$0xff] }
   0x3   :  { %166 = vperm.xlu0 %677, %v72_v0   ;;  %146 = vperm.xlu2 %679, %v68_v2   ;;  %v659_v6 = vld [vmem:[%s972_s1 + $0x20] sm:$0xff]  ;;  %v666_v8 = vld [vmem:[%s972_s1 + $0x58] sm:$0xff]  ;;  %v71_v10 = vld [vmem:[%s973_s2 + $0x70] sm:$0xff] }
   0x4   :  { %391 = vmatpush.bf16.msra.mxu0 %v671_v4  ;;  %672 = vmatpush.bf16.msra.mxu1 %v671_v4  ;;  %v69_v9 = vld [vmem:[%s973_s2 + $0x60] sm:$0xff]  ;;  %v88_v11 = vld [vmem:[%s973_s2 + $0xf8] sm:$0xff] }
   0x5   :  { %673 = vmatpush.bf16.msra.mxu2 %v671_v4  ;;  %674 = vmatpush.bf16.msra.mxu3 %v671_v4 }
   0x7   :  { %639 = vmatmul.msk.bf16.vlgmr.msra.gmra.mxu0 %vm335_vm0, %v655_v5  ;;  %643 = vmatmul.msk.bf16.vlgmr.msra.gmra.mxu1 %vm335_vm0, %v659_v6 }
   0x8   :  { %645 = vmatmul.msk.bf16.vlgmr.msra.gmra.mxu2 %vm335_vm0, %v661_v7  ;;  %650 = vmatmul.msk.bf16.vlgmr.msra.gmra.mxu3 %vm335_vm0, %v666_v8 }
   0x9   :  { %11 = vsyncpa [#allocation4], 0  ;;  %v87_v12 = vld [vmem:[%s973_s2 + $0xf0] sm:$0xff]  ;;  %v66_v14 = vld [vmem:[%s973_s2 + $0x48] sm:$0xff]  ;;  %s707_s13 = smov [#allocation3]   ;;  %s562_s17 = sshll.u32 %s976_s5, 4  ;;  %s563_s17 = int_to_ptr.hbm [resolvable:$true] %s562_s17 }
   0xa   :  { %151 = vperm.xlu1 %678, %v69_v9   ;;  %v67_v13 = vld [vmem:[%s973_s2 + $0x50] sm:$0xff]  ;;  %v656_v15 = vld [vmem:[%s972_s1 + $0x8] sm:$0xff]  ;;  %v662_v17 = vld [vmem:[%s972_s1 + $0x38] sm:$0xff]  ;;  %s560_s14 = sshll.u32 %s707_s13, 4  ;;  %vm553_vm1 = vcmask 8192   ;;  %s561_s14 = int_to_ptr.vmem [resolvable:$true] %s560_s14 }
   0xb   :  { %161 = vperm.xlu0 %677, %v71_v10   ;;  %246 = vperm.xlu2 %679, %v88_v11   ;;  %v660_v16 = vld [vmem:[%s972_s1 + $0x28] sm:$0xff]  ;;  %v667_v18 = vld [vmem:[%s972_s1 + $0x60] sm:$0xff]  ;;  %v84_v22 = vld [vmem:[%s973_s2 + $0xd8] sm:$0xff] }
   0xc   :  { %v65_v19 = vld [vmem:[%s973_s2 + $0x40] sm:$0xff]  ;;  %v86_v20 = vld [vmem:[%s973_s2 + $0xe8] sm:$0xff]  ;;  %v64_v23 = vld [vmem:[%s973_s2 + $0x38] sm:$0xff] }
   0xd   :  { %v85_v21 = vld [vmem:[%s973_s2 + $0xe0] sm:$0xff]  ;;  %v63_v24 = vld [vmem:[%s973_s2 + $0x30] sm:$0xff]  ;;  %v668_v27 = vld [vmem:[%s972_s1 + $0x68] sm:$0xff] }
   0xe   :  { %v657_v25 = vld [vmem:[%s972_s1 + $0x10] sm:$0xff]  ;;  %v663_v26 = vld [vmem:[%s972_s1 + $0x40] sm:$0xff]  ;;  %v62_v28 = vld [vmem:[%s973_s2 + $0x28] sm:$0xff] }
   0xf   :  { %v83_v29 = vld [vmem:[%s973_s2 + $0xd0] sm:$0xff]  ;;  %v82_v30 = vld [vmem:[%s973_s2 + $0xc8] sm:$0xff]  ;;  %v81_v31 = vld [vmem:[%s973_s2 + $0xc0] sm:$0xff] }
  0x10   :  { %v61_v32 = vld [vmem:[%s973_s2 + $0x20] sm:$0xff]  ;;  %v60_v33 = vld [vmem:[%s973_s2 + $0x18] sm:$0xff]  ;;  %v664_v35 = vld [vmem:[%s972_s1 + $0x48] sm:$0xff] }
  0x11   :  { %v658_v34 = vld [vmem:[%s972_s1 + $0x18] sm:$0xff]  ;;  %v669_v36 = vld [vmem:[%s972_s1 + $0x70] sm:$0xff]  ;;  %v78_v40 = vld [vmem:[%s973_s2 + $0xa8] sm:$0xff] }
  0x12   :  { %241 = vperm.xlu1 %678, %v87_v12   ;;  %v59_v37 = vld [vmem:[%s973_s2 + $0x10] sm:$0xff]  ;;  %v80_v38 = vld [vmem:[%s973_s2 + $0xb8] sm:$0xff]  ;;  %v58_v41 = vld [vmem:[%s973_s2 + $0x8] sm:$0xff] }
  0x13   :  { %141 = vperm.xlu0 %677, %v67_v13   ;;  %136 = vperm.xlu2 %679, %v66_v14   ;;  %v79_v39 = vld [vmem:[%s973_s2 + $0xb0] sm:$0xff]  ;;  %v57_v42 = vld [vmem:[%s973_s2] sm:$0xff]  ;;  %v670_v44 = vld [vmem:[%s972_s1 + $0x78] sm:$0xff] }
  0x14   :  { %v665_v43 = vld [vmem:[%s972_s1 + $0x50] sm:$0xff]  ;;  %v76_v45 = vld [vmem:[%s973_s2 + $0x98] sm:$0xff]  ;;  %v77_v46 = vld [vmem:[%s973_s2 + $0xa0] sm:$0xff] }
  0x15   :  { %v75_v47 = vld [vmem:[%s973_s2 + $0x90] sm:$0xff]  ;;  %v73_v48 = vld [vmem:[%s973_s2 + $0x80] sm:$0xff]  ;;  %v74_v49 = vld [vmem:[%s973_s2 + $0x88] sm:$0xff] }
  0x17   :  { %640 = vmatmul.msk.bf16.gmra.mxu0 %vm335_vm0, %v656_v15  ;;  %644 = vmatmul.msk.bf16.gmra.mxu1 %vm335_vm0, %v660_v16 }
  0x18   :  { %646 = vmatmul.msk.bf16.gmra.mxu2 %vm335_vm0, %v662_v17  ;;  %651 = vmatmul.msk.bf16.gmra.mxu3 %vm335_vm0, %v667_v18 }
  0x1a   :  { %131 = vperm.xlu1 %678, %v65_v19  }
  0x1b   :  { %236 = vperm.xlu0 %677, %v86_v20   ;;  %231 = vperm.xlu2 %679, %v85_v21  }
  0x22   :  { %226 = vperm.xlu1 %678, %v84_v22  }
  0x23   :  { %126 = vperm.xlu0 %677, %v64_v23   ;;  %121 = vperm.xlu2 %679, %v63_v24  }
  0x27   :  { %641 = vmatmul.msk.bf16.gmra.mxu0 %vm335_vm0, %v657_v25 }
  0x28   :  { %647 = vmatmul.msk.bf16.gmra.mxu2 %vm335_vm0, %v663_v26  ;;  %652 = vmatmul.msk.bf16.gmra.mxu3 %vm335_vm0, %v668_v27 }
  0x2a   :  { %116 = vperm.xlu1 %678, %v62_v28  }
  0x2b   :  { %221 = vperm.xlu0 %677, %v83_v29   ;;  %216 = vperm.xlu2 %679, %v82_v30  }
  0x32   :  { %211 = vperm.xlu1 %678, %v81_v31  }
  0x33   :  { %111 = vperm.xlu0 %677, %v61_v32   ;;  %106 = vperm.xlu2 %679, %v60_v33  }
  0x37   :  { %642 = vmatmul.msk.bf16.gmra.mxu0 %vm335_vm0, %v658_v34 }
  0x38   :  { %648 = vmatmul.msk.bf16.gmra.mxu2 %vm335_vm0, %v664_v35  ;;  %653 = vmatmul.msk.bf16.gmra.mxu3 %vm335_vm0, %v669_v36 }
  0x3a   :  { %101 = vperm.xlu1 %678, %v59_v37  }
  0x3b   :  { %206 = vperm.xlu0 %677, %v80_v38   ;;  %201 = vperm.xlu2 %679, %v79_v39  }
  0x42   :  { %196 = vperm.xlu1 %678, %v78_v40  }
  0x43   :  { %96 = vperm.xlu0 %677, %v58_v41   ;;  %91 = vperm.xlu2 %679, %v57_v42  }
  0x48   :  { %649 = vmatmul.msk.bf16.gmra.mxu2 %vm335_vm0, %v665_v43  ;;  %654 = vmatmul.msk.bf16.gmra.mxu3 %vm335_vm0, %v670_v44 }
  0x4a   :  { %186 = vperm.xlu1 %678, %v76_v45  }
  0x4b   :  { %191 = vperm.xlu0 %677, %v77_v46   ;;  %181 = vperm.xlu2 %679, %v75_v47  }
  0x52   :  { %171 = vperm.xlu1 %678, %v73_v48  }
  0x53   :  { %176 = vperm.xlu0 %677, %v74_v49  }
  0x5d   :  { %v147_v51 = vpop.permute.xlu2 %146 }
  0x65   :  { %v901_v54 = vpop.permute.xlu2 %246 }
  0x6d   :  { %v137_v59 = vpop.permute.xlu2 %136 }
  0x74   :  { %v157_v52 = vpop.permute.xlu1 %156 }
  0x75   :  { %v167_v50 = vpop.permute.xlu0 %166  ;;  %v915_v4 = vpop.permute.xlu2 %231 }
  0x7c   :  { %v152_v56 = vpop.permute.xlu1 %151 }
  0x7d   :  { %v162_v53 = vpop.permute.xlu0 %161  ;;  %v122_v12 = vpop.permute.xlu2 %121 }
  0x84   :  { %v903_v55 = vpop.f32.mrf.mxu0  ;;  %v413_v57 = vpop.f32.mrf.mxu1 }
  0x85   :  { %v142_v58 = vpop.permute.xlu0 %141  ;;  %v909_v63 = vpop.permute.xlu1 %241 }
  0x86   :  { %v927_v23 = vpop.permute.xlu2 %216 }
  0x8b   :  { %v423_v60 = vpop.f32.mrf.mxu2  ;;  %v905_v61 = vpop.f32.mrf.mxu3 }
  0x8c   :  { %v907_v62 = vpop.f32.mrf.mxu0  ;;  %v415_v0 = vpop.f32.mrf.mxu1  ;;  %v424_v24 = vadd.f32 %v423_v60, %v152_v56 }
  0x8d   :  { %v911_v1 = vpop.permute.xlu0 %236  ;;  %v132_v6 = vpop.permute.xlu1 %131  ;;  %v416_v32 = vadd.f32 %v415_v0, %v137_v59 }
  0x8e   :  { %v485_v29 = vmax.f32 %v424_v24, 0.0  ;;  %v414_v35 = vadd.f32 %v413_v57, %v132_v6  ;;  %v107_v40 = vpop.permute.xlu2 %106 }
  0x8f   :  { %v482_v39 = vmax.f32 %v416_v32, 0.0 }
  0x90   :  { %v481_v42 = vmax.f32 %v414_v35, 0.0 }
  0x93   :  { %v425_v2 = vpop.f32.mrf.mxu2  ;;  %v913_v3 = vpop.f32.mrf.mxu3 }
  0x94   :  { %v917_v5 = vpop.f32.mrf.mxu0  ;;  %v418_v11 = vpop.f32.mrf.mxu1  ;;  %v426_v19 = vadd.f32 %v425_v2, %v157_v52 }
  0x95   :  { %v127_v9 = vpop.permute.xlu0 %126  ;;  %v923_v15 = vpop.permute.xlu1 %226  ;;  %v419_v30 = vadd.f32 %v418_v11, %v142_v58 }
  0x96   :  { %v486_v26 = vmax.f32 %v426_v19, 0.0  ;;  %v937_v48 = vpop.permute.xlu2 %201  ;;  %v945_v19 = vld [vmem:[%s974_s3] sm:$0x3] }
  0x97   :  { %v483_v36 = vmax.f32 %v419_v30, 0.0 }
  0x9b   :  { %v428_v7 = vpop.f32.mrf.mxu2  ;;  %v919_v8 = vpop.f32.mrf.mxu3 }
  0x9c   :  { %v400_v10 = vpop.f32.mrf.mxu0  ;;  %v429_v16 = vadd.f32 %v428_v7, %v162_v53  ;;  %v420_v22 = vpop.f32.mrf.mxu1 }
  0x9d   :  { %v925_v20 = vpop.permute.xlu0 %221  ;;  %v421_v27 = vadd.f32 %v420_v22, %v147_v51  ;;  %v117_v34 = vpop.permute.xlu1 %116  ;;  %v401_v59 = vadd.f32 %v400_v10, %v107_v40 }
  0x9e   :  { %v487_v25 = vmax.f32 %v429_v16, 0.0 }
  0x9f   :  { %v484_v33 = vmax.f32 %v421_v27, 0.0  ;;  %v476_v16 = vmax.f32 %v401_v59, 0.0 }
  0xa3   :  { %v430_v13 = vpop.f32.mrf.mxu2  ;;  %v921_v14 = vpop.f32.mrf.mxu3 }
  0xa4   :  { %v431_v17 = vadd.f32 %v430_v13, %v167_v50  ;;  %v403_v18 = vpop.f32.mrf.mxu0  ;;  %v92_v13 = vpop.permute.xlu2 %91 }
  0xa5   :  { %v112_v37 = vpop.permute.xlu0 %111  ;;  %v212_v44 = vpop.permute.xlu1 %211 }
  0xa6   :  { %v488_v21 = vmax.f32 %v431_v17, 0.0  ;;  %v404_v56 = vadd.f32 %v403_v18, %v112_v37 }
  0xa8   :  { %513 = vmatpush.msrb.mxu1 %v488_v21  ;;  %v477_v6 = vmax.f32 %v404_v56, 0.0  ;;  %v509_v21 = vperm.slane %v945_v19, 0 }
  0xaa   :  { %514 = vmatpush.msrb.mxu1 %v487_v25 }
  0xab   :  { %v929_v28 = vpop.f32.mrf.mxu3  ;;  %v931_v38 = vpop.f32.mrf.mxu2 }
  0xac   :  { %515 = vmatpush.msrb.mxu1 %v486_v26  ;;  %v405_v31 = vpop.f32.mrf.mxu0 }
  0xad   :  { %v933_v45 = vpop.permute.xlu0 %206  ;;  %v406_v52 = vadd.f32 %v405_v31, %v117_v34  ;;  %v102_v58 = vpop.permute.xlu1 %101  ;;  %v459_v34 = vadd.f32 %v929_v28, %v925_v20  ;;  %v449_v20 = vadd.f32 %v905_v61, %v937_v48 }
  0xae   :  { %516 = vmatpush.msrb.mxu1 %v485_v29  ;;  %v399_v7 = vadd.f32 %v917_v5, %v102_v58  ;;  %v507_v58 = vstv %s975_s4 }
  0xaf   :  { %v478_v60 = vmax.f32 %v406_v52, 0.0 }
  0xb0   :  { %517 = vmatpush.msrb.mxu1 %v484_v33  ;;  %v475_v17 = vmax.f32 %v399_v7, 0.0 }
  0xb2   :  { %518 = vmatpush.msrb.mxu1 %v483_v36 }
  0xb3   :  { %v460_v41 = vpop.f32.mrf.mxu3  ;;  %v935_v46 = vpop.f32.mrf.mxu2 }
  0xb4   :  { %519 = vmatpush.msrb.mxu1 %v482_v39  ;;  %v408_v43 = vpop.f32.mrf.mxu0  ;;  %v461_v32 = vadd.f32 %v460_v41, %v923_v15  ;;  %v451_v15 = vadd.f32 %v913_v3, %v933_v45  ;;  %v495_v41 = vmax.f32 %v449_v20, 0.0 }
  0xb5   :  { %v409_v50 = vadd.f32 %v408_v43, %v122_v12  ;;  %v97_v2 = vpop.permute.xlu0 %96  ;;  %v394_v12 = vadd.f32 %v903_v55, %v92_v13  ;;  %v197_v30 = vpop.permute.xlu1 %196 }
  0xb6   :  { %520 = vmatpush.msrb.mxu1 %v481_v42 }
  0xb7   :  { %v479_v57 = vmax.f32 %v409_v50, 0.0  ;;  %v473_v5 = vmax.f32 %v394_v12, 0.0 }
  0xbb   :  { %v463_v47 = vpop.f32.mrf.mxu3  ;;  %v438_v11 = vpop.f32.mrf.mxu2 }
  0xbc   :  { %v410_v49 = vpop.f32.mrf.mxu0  ;;  %v464_v27 = vadd.f32 %v463_v47, %v915_v4  ;;  %v499_v4 = vmax.f32 %v459_v34, 0.0 }
  0xbd   :  { %v411_v51 = vadd.f32 %v410_v49, %v127_v9  ;;  %v396_v9 = vadd.f32 %v907_v62, %v97_v2  ;;  %v192_v36 = vpop.permute.xlu0 %191  ;;  %v187_v39 = vpop.permute.xlu1 %186 }
  0xbe   :  { %v501_v35 = vmax.f32 %v464_v27, 0.0 }
  0xbf   :  { %v480_v53 = vmax.f32 %v411_v51, 0.0  ;;  %v474_v18 = vmax.f32 %v396_v9, 0.0 }
  0xc1   :  { %521 = vmatpush.msrb.mxu1 %v480_v53  ;;  %v510_v53 = vperm.slane %v945_v19, 1 }
  0xc3   :  { %v465_v0 = vpop.f32.mrf.mxu3  ;;  %522 = vmatpush.msrb.mxu1 %v479_v57  ;;  %v440_v22 = vpop.f32.mrf.mxu2 }
  0xc4   :  { %v466_v25 = vadd.f32 %v465_v0, %v911_v1  ;;  %v454_v1 = vadd.f32 %v919_v8, %v212_v44  ;;  %v441_v42 = vadd.f32 %v440_v22, %v187_v39  ;;  %v182_v44 = vpop.permute.xlu2 %181 }
  0xc5   :  { %523 = vmatpush.msrb.mxu1 %v478_v60  ;;  %v177_v47 = vpop.permute.xlu0 %176  ;;  %v439_v3 = vadd.f32 %v438_v11, %v182_v44  ;;  %v172_v49 = vpop.permute.xlu1 %171 }
  0xc6   :  { %v502_v33 = vmax.f32 %v466_v25, 0.0  ;;  %v497_v28 = vmax.f32 %v454_v1, 0.0  ;;  %v492_v50 = vmax.f32 %v441_v42, 0.0  ;;  %v436_v61 = vadd.f32 %v935_v46, %v177_v47 }
  0xc7   :  { %524 = vmatpush.msrb.mxu1 %v477_v6  ;;  %v491_v48 = vmax.f32 %v439_v3, 0.0  ;;  %v434_v51 = vadd.f32 %v931_v38, %v172_v49 }
  0xc8   :  { %v490_v52 = vmax.f32 %v436_v61, 0.0 }
  0xc9   :  { %525 = vmatpush.msrb.mxu1 %v476_v16  ;;  %v489_v56 = vmax.f32 %v434_v51, 0.0 }
  0xcb   :  { %v468_v10 = vpop.f32.mrf.mxu3  ;;  %526 = vmatpush.msrb.mxu1 %v475_v17  ;;  %v443_v31 = vpop.f32.mrf.mxu2 }
  0xcc   :  { %v469_v55 = vadd.f32 %v468_v10, %v909_v63  ;;  %v500_v63 = vmax.f32 %v461_v32, 0.0  ;;  %v444_v8 = vadd.f32 %v443_v31, %v192_v36 }
  0xcd   :  { %527 = vmatpush.msrb.mxu1 %v474_v18 }
  0xce   :  { %v503_v29 = vmax.f32 %v469_v55, 0.0  ;;  %v493_v45 = vmax.f32 %v444_v8, 0.0 }
  0xcf   :  { %528 = vmatpush.msrb.mxu1 %v473_v5 }
  0xd0   :  { %529 = vmatmul.f32.vlgmr.msrb.gmra.mxu1 %v509_v21 }
  0xd3   :  { %v470_v62 = vpop.f32.mrf.mxu3  ;;  %v445_v40 = vpop.f32.mrf.mxu2 }
  0xd4   :  { %v471_v24 = vadd.f32 %v470_v62, %v901_v54  ;;  %v456_v54 = vadd.f32 %v921_v14, %v927_v23  ;;  %v496_v14 = vmax.f32 %v451_v15, 0.0  ;;  %v446_v23 = vadd.f32 %v445_v40, %v197_v30 }
  0xd6   :  { %v504_v26 = vmax.f32 %v471_v24, 0.0  ;;  %v498_v37 = vmax.f32 %v456_v54, 0.0  ;;  %v494_v43 = vmax.f32 %v446_v23, 0.0 }
  0xd8   :  { %533 = vmatpush.msra.mxu1 %v504_v26 }
  0xda   :  { %534 = vmatpush.msra.mxu1 %v503_v29 }
  0xdc   :  { %535 = vmatpush.msra.mxu1 %v502_v33 }
  0xde   :  { %536 = vmatpush.msra.mxu1 %v501_v35 }
  0xe0   :  { %537 = vmatpush.msra.mxu1 %v500_v63 }
  0xe2   :  { %538 = vmatpush.msra.mxu1 %v499_v4 }
  0xe4   :  { %539 = vmatpush.msra.mxu1 %v498_v37 }
  0xe6   :  { %540 = vmatpush.msra.mxu1 %v497_v28 }
  0xe8   :  { %541 = vmatpush.msra.mxu1 %v496_v14 }
  0xea   :  { %542 = vmatpush.msra.mxu1 %v495_v41 }
  0xec   :  { %543 = vmatpush.msra.mxu1 %v494_v43 }
  0xee   :  { %544 = vmatpush.msra.mxu1 %v493_v45 }
  0xf0   :  { %545 = vmatpush.msra.mxu1 %v492_v50 }
  0xf2   :  { %546 = vmatpush.msra.mxu1 %v491_v48 }
  0xf4   :  { %547 = vmatpush.msra.mxu1 %v490_v52 }
  0xf6   :  { %548 = vmatpush.msra.mxu1 %v489_v56 }
  0xf7   :  { %549 = vmatmul.f32.vlgmr.msra.gmra.mxu1 %v510_v53 }
 0x14d   :  { %v530_v57 = vpop.f32.mrf.mxu1 }
 0x14e   :  { %v531_v38 = vadd.f32 %v530_v57, %v507_v58 }
 0x174   :  { %v550_v46 = vpop.f32.mrf.mxu1 }
 0x175   :  { %v551_v59 = vadd.f32 %v550_v46, %v531_v38 }
 0x177   :  { %554 = vst.msk [vmem:[#allocation3] sm:$0x1] %vm553_vm1, %v551_v59 }
 0x178   :  { %565 = dma.vmem_to_hbm [thread:$0]  %s561_s14, 16, %s563_s17, [#allocation4]  }
 0x179   :  { %704 = dma.done.wait [#allocation4], 16  }
 0x17a   :  { %705 = vsyncadd [#allocation4], 4294967280 }
 0x17b   :  { %570 = vsyncpa [#allocation4], 1 }

</bundles_post_ra>
